<compile_context>
chip_gen: v7x
topology: tpu7x:2x2x1
jax: 0.10.0
libtpu: 0.0.40
codegen_flags: <defaults>
</compile_context>

<pallas_src>
import jax
import jax.numpy as jnp
from jax.experimental import pallas as pl
from jax.experimental.pallas import tpu as pltpu

_LANE = 128
_SUBLANE = 8


def _round_up(x, m):
    return ((x + m - 1) // m) * m


def _mlp_sim_head_kernel(r1_ref, r2_ref, w_abs_ref, w_mul_ref, b_ref, out_ref):
    r1 = r1_ref[...]                          # (TB, H)
    r2 = r2_ref[...]                          # (TB, H)
    # Elementwise feature construction on the VPU.
    f_abs = jnp.abs(r1 - r2)                  # (TB, H)
    f_mul = r1 * r2                           # (TB, H)

    w_abs = w_abs_ref[...]                    # (H, C_pad), resident across grid
    w_mul = w_mul_ref[...]                    # (H, C_pad)
    if f_abs.dtype != w_abs.dtype:            # static dtype decision
        f_abs = f_abs.astype(w_abs.dtype)
        f_mul = f_mul.astype(w_mul.dtype)

    # Two K=H MXU dots accumulated in f32 (same vmatmul work as one fused
    # K=2H dot, but no (TB, 2H) concat intermediate / copy pass).
    acc = jnp.dot(f_abs, w_abs, preferred_element_type=jnp.float32)
    acc = acc + jnp.dot(f_mul, w_mul, preferred_element_type=jnp.float32)
    out_ref[...] = (acc + b_ref[...]).astype(out_ref.dtype)   # lane-dense (TB, C_pad)


def prepare_mlp_sim_head_params(weight, bias, param_dtype=None):
    """One-time parameter prep (hoist out of the forward pass).

    weight: (C, 2H) PyTorch nn.Linear layout; bias: (C,).
    Returns (w_abs (H, C_pad), w_mul (H, C_pad), b_packed (1, C_pad), num_cls).
    The class dim is zero-padded to a multiple of 128 for lane-dense stores and
    the weight is transposed + split into the |r1-r2| and r1*r2 halves.
    param_dtype=jnp.bfloat16 is recommended on v5e (bf16-native MXU); it halves
    weight VMEM/DMA on v6e/v7x as well.
    """
    C, twoH = weight.shape
    assert twoH % 2 == 0
    H = twoH // 2
    c_pad = _round_up(max(C, 1), _LANE)

    w = jnp.asarray(weight)
    if param_dtype is not None:
        w = w.astype(param_dtype)
    w_t = w.T                                                     # (2H, C)
    w_abs = jnp.zeros((H, c_pad), dtype=w_t.dtype).at[:, :C].set(w_t[:H])
    w_mul = jnp.zeros((H, c_pad), dtype=w_t.dtype).at[:, :C].set(w_t[H:])
    b_packed = jnp.zeros((1, c_pad), dtype=jnp.float32).at[0, :C].set(
        jnp.asarray(bias).astype(jnp.float32))
    return w_abs, w_mul, b_packed, C


def mlp_sim_head(rep_sent1, rep_sent2, w_abs, w_mul, b_packed, num_cls, *, block_b=1024):
    """rep_sent1, rep_sent2: (B, H). Params from prepare_mlp_sim_head_params."""
    B, H = rep_sent1.shape
    assert rep_sent2.shape == (B, H)
    assert w_abs.shape[0] == H and w_mul.shape == w_abs.shape
    c_pad = w_abs.shape[1]

    # Batch tile: multiple of 8 sublanes, aiming for >= ~4 grid steps when B
    # allows it (keeps both v7x TensorCores fed on the "parallel" axis), capped
    # at block_b. No wrapper-side jnp.pad: the ragged final block is handled by
    # Pallas (reads padded, writes masked), so HBM traffic is exactly the data.
    tb = min(block_b, _round_up(pl.cdiv(B, 4), _SUBLANE))
    tb = max(tb, _SUBLANE)
    grid = (pl.cdiv(B, tb),)

    in_bytes = jnp.dtype(rep_sent1.dtype).itemsize
    w_bytes = jnp.dtype(w_abs.dtype).itemsize
    out_bytes = 4  # f32 logits

    cost = pl.CostEstimate(
        flops=2 * B * (2 * H) * c_pad,
        transcendentals=0,
        bytes_accessed=(in_bytes * 2 * B * H            # r1 + r2
                        + w_bytes * 2 * H * c_pad       # both weight halves
                        + 4 * c_pad                     # bias
                        + out_bytes * B * c_pad),       # logits
    )

    # Scoped-VMEM budget: double-buffered activation/output tiles + the
    # (default double-buffered) resident weight halves and bias, with headroom.
    vmem_need = (2 * 2 * tb * H * in_bytes
                 + 2 * 2 * H * c_pad * w_bytes
                 + 2 * 1 * c_pad * 4
                 + 2 * tb * c_pad * out_bytes)
    vmem_limit = int(min(max(2 * vmem_need, 16 << 20), 64 << 20))

    logits_pad = pl.pallas_call(
        _mlp_sim_head_kernel,
        out_shape=jax.ShapeDtypeStruct((B, c_pad), jnp.float32),
        grid=grid,
        in_specs=[
            pl.BlockSpec((tb, H), lambda i: (i, 0)),          # r1 tile
            pl.BlockSpec((tb, H), lambda i: (i, 0)),          # r2 tile
            pl.BlockSpec((H, c_pad), lambda i: (0, 0)),       # W half (|r1-r2|), resident
            pl.BlockSpec((H, c_pad), lambda i: (0, 0)),       # W half (r1*r2), resident
            pl.BlockSpec((1, c_pad), lambda i: (0, 0)),       # bias, resident
        ],
        out_specs=pl.BlockSpec((tb, c_pad), lambda i: (i, 0)),
        compiler_params=pltpu.CompilerParams(
            dimension_semantics=("parallel",),                # megacore on v7x
            vmem_limit_bytes=vmem_limit,
        ),
        cost_estimate=cost,
    )(rep_sent1, rep_sent2, w_abs, w_mul, b_packed)

    logits = logits_pad[:, :num_cls]
    return (logits,)


def mlp_sim_head_with_labels(rep_sent1, rep_sent2, w_abs, w_mul, b_packed, num_cls,
                             labels, reduction="mean"):
    """Optional labels path: CrossEntropyLoss(reduction) on the Pallas logits."""
    (logits,) = mlp_sim_head(rep_sent1, rep_sent2, w_abs, w_mul, b_packed, num_cls)
    logp = jax.nn.log_softmax(logits, axis=-1)
    nll = -jnp.take_along_axis(logp, labels[:, None], axis=-1)[:, 0]
    if reduction == "mean":
        loss = jnp.mean(nll)
    elif reduction == "sum":
        loss = jnp.sum(nll)
    else:
        loss = nll
    return (loss, logits)


# TODO(synk): Dropout (train-mode) and the use_extra_hidden LinearWithAct proj are not
# implemented; this covers the symmetry=True, use_extra_hidden=False, eval-mode config.


if __name__ == "__main__":
    # Small, module-consistent shapes: batch=8, hidden=32, num_cls=4.
    B, H, C = 8, 32, 4
    key = jax.random.PRNGKey(0)
    k1, k2, k3, k4 = jax.random.split(key, 4)

    rep_sent1 = jax.random.normal(k1, (B, H), dtype=jnp.float32)
    rep_sent2 = jax.random.normal(k2, (B, H), dtype=jnp.float32)

    # Deterministic Linear(2H -> C) params (PyTorch-style uniform init bound).
    bound = 1.0 / (2 * H) ** 0.5
    weight = jax.random.uniform(k3, (C, 2 * H), minval=-bound, maxval=bound, dtype=jnp.float32)
    bias = jax.random.uniform(k4, (C,), minval=-bound, maxval=bound, dtype=jnp.float32)

    # One-time parameter prep (would live at module init in a real model).
    w_abs, w_mul, b_packed, num_cls = prepare_mlp_sim_head_params(weight, bias)

    (logits,) = mlp_sim_head(rep_sent1, rep_sent2, w_abs, w_mul, b_packed, num_cls)
    logits = jax.block_until_ready(logits)

    # Pure-JAX reference check of the forward pass.
    def ref_fwd(r1, r2):
        feats = jnp.concatenate([jnp.abs(r1 - r2), r1 * r2], axis=-1)
        return feats @ weight.T + bias

    ref = ref_fwd(rep_sent1, rep_sent2)
    assert logits.shape == (B, C)
    assert jnp.allclose(logits, ref, atol=1e-5, rtol=1e-5)

    # Ragged-batch check (B not a multiple of the tile / sublane count) —
    # exercises the no-pad, masked final block path.
    Br = 13
    r1r = jax.random.normal(jax.random.PRNGKey(2), (Br, H), dtype=jnp.float32)
    r2r = jax.random.normal(jax.random.PRNGKey(3), (Br, H), dtype=jnp.float32)
    (logits_r,) = mlp_sim_head(r1r, r2r, w_abs, w_mul, b_packed, num_cls)
    logits_r = jax.block_until_ready(logits_r)
    assert logits_r.shape == (Br, C)
    assert jnp.allclose(logits_r, ref_fwd(r1r, r2r), atol=1e-5, rtol=1e-5)

    # Exercise the optional labels branch once as well.
    labels = jax.random.randint(jax.random.PRNGKey(1), (B,), 0, C)
    loss, _ = mlp_sim_head_with_labels(rep_sent1, rep_sent2, w_abs, w_mul, b_packed,
                                       num_cls, labels)
    jax.block_until_ready(loss)

    print("KERNEL_OK")
</pallas_src>

<mosaic_0001>
module attributes {stable_mosaic.version = 11 : i64} {
  func.func @_mlp_sim_head_kernel(%arg0: i32, %arg1: memref<8x32xf32, #tpu.memory_space<vmem>>, %arg2: memref<8x32xf32, #tpu.memory_space<vmem>>, %arg3: memref<32x128xf32, #tpu.memory_space<vmem>>, %arg4: memref<32x128xf32, #tpu.memory_space<vmem>>, %arg5: memref<1x128xf32, #tpu.memory_space<vmem>>, %arg6: memref<8x128xf32, #tpu.memory_space<vmem>>) attributes {dimension_semantics = [#tpu.dimension_semantics<parallel>], iteration_bounds = array<i64: 1>, scalar_prefetch = 0 : i64, scratch_operands = 0 : i64, tpu.core_type = #tpu.core_type<tc>, window_params = [{transform_indices = @transform_0, window_bounds = array<i64: 8, 32>}, {transform_indices = @transform_1, window_bounds = array<i64: 8, 32>}, {pipeline_mode = #tpu.pipeline_mode<synchronous>, transform_indices = @transform_2, window_bounds = array<i64: 32, 128>}, {pipeline_mode = #tpu.pipeline_mode<synchronous>, transform_indices = @transform_3, window_bounds = array<i64: 32, 128>}, {pipeline_mode = #tpu.pipeline_mode<synchronous>, transform_indices = @transform_4, window_bounds = array<i64: 1, 128>}, {transform_indices = @transform_5, window_bounds = array<i64: 8, 128>}]} {
    %c0 = arith.constant 0 : index
    %c0_0 = arith.constant 0 : index
    %0 = vector.load %arg1[%c0, %c0_0] : memref<8x32xf32, #tpu.memory_space<vmem>>, vector<8x32xf32>
    %c0_1 = arith.constant 0 : index
    %c0_2 = arith.constant 0 : index
    %1 = vector.load %arg2[%c0_1, %c0_2] : memref<8x32xf32, #tpu.memory_space<vmem>>, vector<8x32xf32>
    %2 = arith.subf %0, %1 : vector<8x32xf32>
    %3 = math.absf %2 : vector<8x32xf32>
    %4 = arith.mulf %0, %1 : vector<8x32xf32>
    %c0_3 = arith.constant 0 : index
    %c0_4 = arith.constant 0 : index
    %5 = vector.load %arg3[%c0_3, %c0_4] : memref<32x128xf32, #tpu.memory_space<vmem>>, vector<32x128xf32>
    %c0_5 = arith.constant 0 : index
    %c0_6 = arith.constant 0 : index
    %6 = vector.load %arg4[%c0_5, %c0_6] : memref<32x128xf32, #tpu.memory_space<vmem>>, vector<32x128xf32>
    %cst = arith.constant dense<0.000000e+00> : vector<8x128xf32>
    %7 = tpu.matmul %3, %5, %cst {dimension_numbers = #tpu.dot_dimension_numbers<[1], [0], [0], [1], [0, 0, 1, 1], [], []>} : vector<8x32xf32>, vector<32x128xf32>, vector<8x128xf32> -> vector<8x128xf32>
    %cst_7 = arith.constant dense<0.000000e+00> : vector<8x128xf32>
    %8 = tpu.matmul %4, %6, %cst_7 {dimension_numbers = #tpu.dot_dimension_numbers<[1], [0], [0], [1], [0, 0, 1, 1], [], []>} : vector<8x32xf32>, vector<32x128xf32>, vector<8x128xf32> -> vector<8x128xf32>
    %9 = arith.addf %7, %8 : vector<8x128xf32>
    %c0_8 = arith.constant 0 : index
    %c0_9 = arith.constant 0 : index
    %10 = vector.load %arg5[%c0_8, %c0_9] : memref<1x128xf32, #tpu.memory_space<vmem>>, vector<1x128xf32>
    %11 = vector.broadcast %10 : vector<1x128xf32> to vector<8x128xf32>
    %12 = arith.addf %9, %11 : vector<8x128xf32>
    %c0_10 = arith.constant 0 : index
    %c0_11 = arith.constant 0 : index
    %13 = vector.load %arg6[%c0_10, %c0_11] : memref<8x128xf32, #tpu.memory_space<vmem>>, vector<8x128xf32>
    tpu.vector_store %arg6[%c0_10, %c0_11], %12 {strides = array<i32>} : memref<8x128xf32, #tpu.memory_space<vmem>>, vector<8x128xf32>,
    return
  }
  func.func @transform_0(%arg0: i32) -> (i32, i32) {
    %c0_i32 = arith.constant 0 : i32
    %c0_i32_0 = arith.constant 0 : i32
    return %arg0, %c0_i32 : i32, i32
  }
  func.func @transform_1(%arg0: i32) -> (i32, i32) {
    %c0_i32 = arith.constant 0 : i32
    %c0_i32_0 = arith.constant 0 : i32
    return %arg0, %c0_i32 : i32, i32
  }
  func.func @transform_2(%arg0: i32) -> (i32, i32) {
    %c0_i32 = arith.constant 0 : i32
    %c0_i32_0 = arith.constant 0 : i32
    %c0_i32_1 = arith.constant 0 : i32
    return %c0_i32, %c0_i32_0 : i32, i32
  }
  func.func @transform_3(%arg0: i32) -> (i32, i32) {
    %c0_i32 = arith.constant 0 : i32
    %c0_i32_0 = arith.constant 0 : i32
    %c0_i32_1 = arith.constant 0 : i32
    return %c0_i32, %c0_i32_0 : i32, i32
  }
  func.func @transform_4(%arg0: i32) -> (i32, i32) {
    %c0_i32 = arith.constant 0 : i32
    %c0_i32_0 = arith.constant 0 : i32
    %c0_i32_1 = arith.constant 0 : i32
    return %c0_i32, %c0_i32_0 : i32, i32
  }
  func.func @transform_5(%arg0: i32) -> (i32, i32) {
    %c0_i32 = arith.constant 0 : i32
    %c0_i32_0 = arith.constant 0 : i32
    return %arg0, %c0_i32 : i32, i32
  }
}

</mosaic_0001>

<bundles_post_ra>
// kernel: tpu_custom_call.1
= control target key start
LH: loop header
LB: loop body
LE: loop exit
PB: predicated region body
PF: predicated region fallthrough
CT: control target
= control target key end

     0   :  { %10 = vsyncpa [#allocation3], 0  ;;  %s536_s0 = inlined_call_operand.hbm [shape: f32[8,32], index: 0, kind: input, shape index: {}]   ;;  %s537_s1 = inlined_call_operand.hbm [shape: f32[8,32], index: 1, kind: input, shape index: {}]   ;;  %s538_s2 = inlined_call_operand.hbm [shape: f32[32,128], index: 2, kind: input, shape index: {}]   ;;  %s539_s3 = inlined_call_operand.hbm [shape: f32[32,128], index: 3, kind: input, shape index: {}]   ;;  %s540_s4 = inlined_call_operand.vmem [shape: f32[1,128], index: 4, kind: input, shape index: {}]   ;;  %s541_s5 = inlined_call_operand.hbm [shape: f32[8,128], index: 5, kind: output, shape index: {}]  }
   0x1   :  { %11 = vsyncpa [#allocation6], 0 }
   0x2   :  { %12 = vsyncpa [#allocation9], 0 }
   0x3   :  { %13 = vsyncpa [#allocation4], 0  ;;  %s433_s18 = smov [#allocation5]   ;;  %s434_s20 = smov [#allocation2]  }
   0x4   :  { %s30_s19 = sshll.u32 %s433_s18, 4  ;;  %s20_s21 = sshll.u32 %s434_s20, 4  ;;  %s31_s19 = int_to_ptr.vmem [resolvable:$true] %s30_s19  ;;  %s21_s21 = int_to_ptr.vmem [resolvable:$true] %s20_s21 }
   0x5   :  { %s315_s24 = scalar_lea.hbm %s537_s1, 128 }
   0x6   :  { %p316_p0 = scmp.ne.s32.totalorder %s537_s1, %s315_s24  ;;  %p319_p1 = scmp.lt.u32.totalorder %s315_s24, %s537_s1 }
   0x8   :  { %p321_p2 = pnand %p319_p1, %p316_p0 }
   0xa   :  { %324 = shalt.err (!%p321_p2)
}
   0xb   :  { %s325_s29 = scalar_lea.vmem %s31_s19, 128  ;;  %p330_p4 = scmp.lt.s32.totalorder %s31_s19, %s31_s19 }
   0xc   :  { %p326_p3 = scmp.ne.s32.totalorder %s31_s19, %s325_s29  ;;  %p331_p5 = scmp.lt.s32.totalorder %s325_s29, %s325_s29 }
   0xe   :  { %p332_p6 = por %p331_p5, %p330_p4 }
  0x10   :  { %p333_p7 = pnand %p332_p6, %p326_p3 }
  0x12   :  { %336 = shalt.err (!%p333_p7)
}
  0x13   :  { %33 = dma.hbm_to_vmem [thread:$0]  %s537_s1, 128, %s31_s19, [#allocation6]  }
  0x14   :  { %s337_s9 = scalar_lea.hbm %s536_s0, 128 }
  0x15   :  { %p338_p8 = scmp.ne.s32.totalorder %s536_s0, %s337_s9  ;;  %p341_p9 = scmp.lt.u32.totalorder %s337_s9, %s536_s0 }
  0x17   :  { %p343_p10 = pnand %p341_p9, %p338_p8 }
  0x19   :  { %346 = shalt.err (!%p343_p10)
}
  0x1a   :  { %s347_s14 = scalar_lea.vmem %s21_s21, 128  ;;  %p352_p12 = scmp.lt.s32.totalorder %s21_s21, %s21_s21 }
  0x1b   :  { %p348_p11 = scmp.ne.s32.totalorder %s21_s21, %s347_s14  ;;  %p353_p13 = scmp.lt.s32.totalorder %s347_s14, %s347_s14 }
  0x1d   :  { %p354_p0 = por %p353_p13, %p352_p12 }
  0x1f   :  { %p355_p1 = pnand %p354_p0, %p348_p11 }
  0x21   :  { %358 = shalt.err (!%p355_p1)
}
  0x22   :  { %23 = dma.hbm_to_vmem [thread:$0]  %s536_s0, 128, %s21_s21, [#allocation3]  }
  0x23   :  { %s435_s16 = smov [#allocation7]   ;;  %s359_s20 = scalar_lea.hbm %s538_s2, 512 }
  0x24   :  { %s39_s17 = sshll.u32 %s435_s16, 4  ;;  %p360_p2 = scmp.ne.s32.totalorder %s538_s2, %s359_s20  ;;  %s40_s17 = int_to_ptr.vmem [resolvable:$true] %s39_s17 }
  0x25   :  { %p363_p3 = scmp.lt.u32.totalorder %s359_s20, %s538_s2 }
  0x27   :  { %p365_p4 = pnand %p363_p3, %p360_p2 }
  0x29   :  { %368 = shalt.err (!%p365_p4)
}
  0x2a   :  { %s369_s26 = scalar_lea.vmem %s40_s17, 512  ;;  %p374_p6 = scmp.lt.s32.totalorder %s40_s17, %s40_s17 }
  0x2b   :  { %p370_p5 = scmp.ne.s32.totalorder %s40_s17, %s369_s26  ;;  %p375_p7 = scmp.lt.s32.totalorder %s369_s26, %s369_s26 }
  0x2d   :  { %p376_p8 = por %p375_p7, %p374_p6 }
  0x2f   :  { %p377_p9 = pnand %p376_p8, %p370_p5 }
  0x31   :  { %380 = shalt.err (!%p377_p9)
}
  0x32   :  { %s436_s0 = smov 128   ;;  %s437_s21 = smov 8  }
  0x33   :  { %45 = dma.hbm_to_vmem [thread:$0]  %s538_s2, 512, %s40_s17, [#allocation6], %s436_s0, %s436_s0, %s437_s21  }
  0x34   :  { %s438_s29 = smov [#allocation8]   ;;  %s381_s8 = scalar_lea.hbm %s539_s3, 512 }
  0x35   :  { %s51_s30 = sshll.u32 %s438_s29, 4  ;;  %p382_p10 = scmp.ne.s32.totalorder %s539_s3, %s381_s8  ;;  %s52_s30 = int_to_ptr.vmem [resolvable:$true] %s51_s30 }
  0x36   :  { %p385_p11 = scmp.lt.u32.totalorder %s381_s8, %s539_s3 }
  0x38   :  { %p387_p12 = pnand %p385_p11, %p382_p10 }
  0x3a   :  { %390 = shalt.err (!%p387_p12)
}
  0x3b   :  { %s391_s13 = scalar_lea.vmem %s52_s30, 512  ;;  %p396_p0 = scmp.lt.s32.totalorder %s52_s30, %s52_s30 }
  0x3c   :  { %p392_p13 = scmp.ne.s32.totalorder %s52_s30, %s391_s13  ;;  %p397_p1 = scmp.lt.s32.totalorder %s391_s13, %s391_s13 }
  0x3e   :  { %p398_p2 = por %p397_p1, %p396_p0 }
  0x40   :  { %p399_p3 = pnand %p398_p2, %p392_p13 }
  0x42   :  { %402 = shalt.err (!%p399_p3)
}
  0x43   :  { %57 = dma.hbm_to_vmem [thread:$0]  %s539_s3, 512, %s52_s30, [#allocation9], %s436_s0, %s436_s0, %s437_s21  }
  0x44   :  { %425 = dma.done.wait [#allocation3], 128  }
  0x45   :  { %426 = vsyncadd [#allocation3], 4294967168 }
  0x46   :  { %427 = dma.done.wait [#allocation6], 640  }
  0x47   :  { %428 = vsyncadd [#allocation6], 4294966656 }
  0x48   :  { %429 = dma.done.wait [#allocation9], 512  }
  0x49   :  { %430 = vsyncadd [#allocation9], 4294966784  ;;  %v439_v0 = vmov 0.0|0.0   ;;  %vm440_vm0 = vmmov 0   ;;  %v441_v1 = vmov 0.0   ;;  %v81_v2 = vld [vmem:[#allocation8] sm:$0xff] }
  0x4a   :  { %293 = vmatprep.subr.bf16.mxu0 %v439_v0  ;;  %299 = vmatprep.subr.bf16.mxu1 %v439_v0  ;;  %v82_v3 = vld [vmem:[#allocation8 + $0x8] sm:$0xff]  ;;  %v77_v4 = vld [vmem:[#allocation7] sm:$0xff]  ;;  %v83_v7 = vld [vmem:[#allocation8 + $0x10] sm:$0xff]  ;;  %vm85_vm1 = vcmask 261120   ;;  %s442_s15 = smov [#allocation10]  }
  0x4b   :  { %279 = vmatprep.mubr.msk.f32.mxu0 %vm440_vm0, %v441_v1  ;;  %290 = vmatprep.mubr.msk.f32.mxu1 %vm440_vm0, %v441_v1  ;;  %v294_v5 = vpack.c.bf16 %v82_v3, %v81_v2  ;;  %v78_v6 = vld [vmem:[#allocation7 + $0x8] sm:$0xff]  ;;  %v84_v8 = vld [vmem:[#allocation8 + $0x18] sm:$0xff]  ;;  %v79_v10 = vld [vmem:[#allocation7 + $0x10] sm:$0xff]  ;;  %s247_s16 = sshll.u32 %s442_s15, 4  ;;  %s248_s16 = int_to_ptr.vmem [resolvable:$true] %s247_s16 }
  0x4c   :  { %v300_v9 = vpack.c.bf16 %v78_v6, %v77_v4  ;;  %v80_v11 = vld [vmem:[#allocation7 + $0x18] sm:$0xff]  ;;  %v72_v12 = vld [vmem:[#allocation2] sm:$0xff]  ;;  %v297_v13 = vpack.c.bf16 %v84_v8, %v83_v7  ;;  %s403_s17 = scalar_lea.vmem %s248_s16, 128  ;;  %p408_p5 = scmp.lt.s32.totalorder %s248_s16, %s248_s16 }
  0x4d   :  { %295 = vmatpush3.bf16.msra.mxu0 %v294_v5  ;;  %v73_v14 = vld [vmem:[#allocation5] sm:$0xff]  ;;  %v303_v15 = vpack.c.bf16 %v80_v11, %v79_v10  ;;  %v260_v21 = vld [vmem:[%s540_s4] ss:$0 sm:$0xff]  ;;  %p404_p4 = scmp.ne.s32.totalorder %s248_s16, %s403_s17  ;;  %p409_p6 = scmp.lt.s32.totalorder %s403_s17, %s403_s17 }
  0x4e   :  { %301 = vmatpush3.bf16.msra.mxu1 %v300_v9  ;;  %296 = vmatprep.subr.bf16.mxu0 %v439_v0  ;;  %v74_v16 = vsub.f32 %v72_v12, %v73_v14  ;;  %v76_v17 = vmul.f32 %v73_v14, %v72_v12 }
  0x4f   :  { %302 = vmatprep.subr.bf16.mxu1 %v439_v0  ;;  %p410_p7 = por %p409_p6, %p408_p5 }
  0x50   :  { %v75_v18 = vand.u32 2147483647, %v74_v16 }
  0x51   :  { %298 = vmatpush3.bf16.msra.mxu0 %v297_v13  ;;  %p411_p8 = pnand %p410_p7, %p404_p4 }
  0x52   :  { %304 = vmatpush3.bf16.msra.mxu1 %v303_v15 }
  0x54   :  { %280 = vmatmul.mubr.msk.f32.vlgmr.msra.gmra.mrb[0].mxu0 %vm85_vm1, %v76_v17 }
  0x55   :  { %291 = vmatmul.mubr.msk.f32.vlgmr.msra.gmra.mrb[0].mxu1 %vm85_vm1, %v75_v18 }
 0x127   :  { %v155_v19 = vpop.f32.mrb[0].mxu0 }
 0x128   :  { %v228_v20 = vpop.f32.mrb[0].mxu1  ;;  %v281_v22 = vpop.f32.mrb[1].mxu0 }
 0x129   :  { %v229_v23 = vadd.f32 %v228_v20, %v155_v19  ;;  %v292_v24 = vpop.f32.mrb[1].mxu1 }
 0x12b   :  { %v239_v25 = vadd.f32 %v260_v21, %v229_v23 }
 0x12d   :  { %240 = vst [vmem:[#allocation10] sm:$0xff] %v239_v25 }
 0x12e   :  { %414 = shalt.err (!%p411_p8)
}
 0x12f   :  { %s415_s20 = scalar_lea.hbm %s541_s5, 128 }
 0x130   :  { %p416_p9 = scmp.ne.s32.totalorder %s541_s5, %s415_s20  ;;  %p419_p10 = scmp.lt.u32.totalorder %s415_s20, %s541_s5 }
 0x132   :  { %p421_p11 = pnand %p419_p10, %p416_p9 }
 0x134   :  { %424 = shalt.err (!%p421_p11)
}
 0x135   :  { %250 = dma.vmem_to_hbm [thread:$0]  %s248_s16, 128, %s541_s5, [#allocation4]  }
 0x136   :  { %431 = dma.done.wait [#allocation4], 128  }
 0x137   :  { %432 = vsyncadd [#allocation4], 4294967168 }
 0x138   :  { %254 = vsyncpa [#allocation3], 1 }
 0x139   :  { %255 = vsyncpa [#allocation6], 1 }
 0x13a   :  { %256 = vsyncpa [#allocation9], 1 }
 0x13b   :  { %257 = vsyncpa [#allocation4], 1 }

</bundles_post_ra>
